<compile_context>
chip_gen: v7x
topology: tpu7x:2x2x1
jax: 0.10.0
libtpu: 0.0.40
codegen_flags: <defaults>
</compile_context>

<pallas_src>
import math

import jax
import jax.numpy as jnp
from jax.experimental import pallas as pl
from jax.experimental.pallas import tpu as pltpu


def _cdiv(a, b):
    return -(-a // b)


def _chip_info():
    """Best-effort chip detection (generation + VMEM capacity) with safe fallbacks."""
    kind = ""
    try:
        kind = jax.devices()[0].device_kind.lower()
    except Exception:
        pass
    is_v7x = "7" in kind
    try:
        vmem_cap = int(pltpu.get_tpu_info().vmem_capacity_bytes)
    except Exception:
        vmem_cap = (64 if is_v7x else 128) * 1024 * 1024
    return is_v7x, vmem_cap


def _choose_tile_v(hw, nc, bytes_per_voxel_col, step_budget_bytes):
    """Largest 128-multiple lane extent whose per-step input blocks fit the budget."""
    tv = step_budget_bytes // max(1, nc * bytes_per_voxel_col)
    tv = max(128, (tv // 128) * 128)
    if tv >= hw:
        return hw            # full-extent lane block (allowed even if hw % 128 != 0)
    return tv


def _make_sdice_kernel(hw_total, tile_v, tiles_per_slice, mask_from, mask_any):
    """Per-tile accumulation kernel, closed over static geometry.

    pred_ref, gt_ref : (N*C, tile_v)  voxel-last (lane-dense) tiles
    out_ref          : (1, N*C, 3)    per-slice sums, columns = [intersect, ref_vol, seg_vol]
    acc_*            : (N*C, 1)       f32 running sums (VMEM scratch)
    """

    def kernel(pred_ref, gt_ref, out_ref, acc_int, acc_refv, acc_seg):
        s = pl.program_id(0)                 # parallel voxel slice (megacore axis)
        i = pl.program_id(1)                 # voxel tile within the slice

        @pl.when(i == 0)
        def _():
            acc_int[...] = jnp.zeros_like(acc_int)
            acc_refv[...] = jnp.zeros_like(acc_refv)
            acc_seg[...] = jnp.zeros_like(acc_seg)

        x = pred_ref[...].astype(jnp.float32)     # (NC, TV)
        y = gt_ref[...].astype(jnp.float32)

        def accumulate(xv, yv):
            # One lane reduce per statistic per tile (vreg-wise VPU adds + small in-vreg tail);
            # no tile_v-wide accumulator RMW in the hot loop.
            acc_int[...] += jnp.sum(xv * yv, axis=-1, keepdims=True)   # intersect
            acc_refv[...] += jnp.sum(yv, axis=-1, keepdims=True)       # ref_vol
            acc_seg[...] += jnp.sum(xv, axis=-1, keepdims=True)        # seg_vol

        if mask_any:
            tile_id = s * tiles_per_slice + i

            @pl.when(tile_id < mask_from)          # fast path: fully valid tile, no mask ops
            def _():
                accumulate(x, y)

            @pl.when(tile_id >= mask_from)         # ragged last tile and phantom tiles only
            def _():
                valid = hw_total - tile_id * tile_v        # <= 0 for phantom tiles
                lane = jax.lax.broadcasted_iota(jnp.int32, (1, tile_v), 1)
                m = lane < valid
                accumulate(jnp.where(m, x, 0.0), jnp.where(m, y, 0.0))
        else:
            accumulate(x, y)

        @pl.when(i == pl.num_programs(1) - 1)
        def _():
            out_ref[0, :, 0:1] = acc_int[...]
            out_ref[0, :, 1:2] = acc_refv[...]
            out_ref[0, :, 2:3] = acc_seg[...]

    return kernel


def sdice_loss(preds, targets, weight_map=None, *, tile_v=None, num_slices=None,
               targets_channels_last=False):
    """SDiceLoss.forward(preds, targets, weight_map=None) as a Pallas TPU kernel.

    preds   : (N, C, *spatial)  float32 / bfloat16 softmax probabilities.
    targets : (N, C, *spatial)  one-hot (f32 / bf16 / int8 are all exact for 0/1), same layout
              as preds by default, or (N, *spatial, C) if targets_channels_last=True.
    Returns scalar f32 loss = mean_c( -log( (2*I_c + 1e-5) / (R_c + S_c + 1 + 1e-5) ) ).
    """
    if weight_map is not None:
        # TODO(synk): weight_map branch of SDiceLoss.forward not implemented (module default is None).
        raise NotImplementedError("weight_map is not supported")
    if preds.ndim < 3:
        raise ValueError("preds must be (N, C, *spatial)")

    N, C = int(preds.shape[0]), int(preds.shape[1])
    HW = int(math.prod(preds.shape[2:]))
    NC = N * C

    if targets_channels_last:
        # Matches the raw PyTorch calling convention; costs one extra HBM transpose pass.
        perm = (0, targets.ndim - 1) + tuple(range(1, targets.ndim - 1))
        targets = jnp.transpose(targets, perm)

    # TODO(synk): integer class-label targets (one-hot synthesized in-kernel) would roughly halve
    # HBM read traffic on bandwidth-bound v5e/v6e; not implemented here.

    # (N*C, HW): free, contiguous views of NCHW / NCDHW — N and C packed onto the sublane axis.
    p2 = preds.reshape(NC, HW)
    g2 = targets.reshape(NC, HW)

    pi = jnp.dtype(preds.dtype).itemsize
    gi = jnp.dtype(targets.dtype).itemsize

    is_v7x, vmem_cap = _chip_info()
    n_buffers = 3 if is_v7x else 2
    # Per-step budget for BOTH input blocks; bigger on v7x where 3.2 TB/s HBM needs larger
    # steps to amortize the ~0.35 us/step pipeline overhead. Always leaves VMEM headroom.
    step_budget = (12 if is_v7x else 8) * 1024 * 1024
    step_budget = min(step_budget, (6 * vmem_cap) // (10 * n_buffers))

    if tile_v is None:
        tile_v = _choose_tile_v(HW, NC, pi + gi, step_budget)
    else:
        tile_v = min(int(tile_v), HW)
        if tile_v < HW:
            tile_v = max(128, (tile_v // 128) * 128)

    total_tiles = _cdiv(HW, tile_v)
    if num_slices is None:
        num_slices = 2 if is_v7x else 1        # 2 TensorCores only on v7x
    n_slices = num_slices if (num_slices > 1 and total_tiles >= num_slices) else 1
    tiles_per_slice = _cdiv(total_tiles, n_slices)
    mask_any = (n_slices * tiles_per_slice * tile_v) != HW
    mask_from = HW // tile_v                   # first tile id that is ragged or phantom
    last_block = (HW - 1) // tile_v

    if tiles_per_slice < 4:
        n_buffers = 2                          # deeper buffering buys nothing on tiny grids

    def in_map(s, i):
        t = s * tiles_per_slice + i
        # Phantom tiles clamp to the last real block (same block index as the preceding step, so
        # the pipeline skips the re-fetch); their contribution is masked to zero in-kernel.
        return (0, jnp.minimum(t, last_block))

    block_bytes = NC * tile_v * (pi + gi)                 # both inputs, one pipeline buffer
    acc_bytes = 3 * 8 * 128 * 4 + NC * 3 * 4              # padded scratch + output block
    vmem_need = n_buffers * block_bytes + acc_bytes + (1 << 20)
    vmem_limit = int(max(32 * 1024 * 1024, vmem_need + (4 << 20)))
    vmem_limit = min(vmem_limit, (17 * vmem_cap) // 20)   # ~85% of capacity: keep headroom
    vmem_limit = max(vmem_limit, vmem_need)

    if n_buffers > 2:
        try:
            in_spec = pl.BlockSpec((NC, tile_v), in_map, pipeline_mode=pl.Buffered(n_buffers))
        except TypeError:
            in_spec = pl.BlockSpec((NC, tile_v), in_map)
    else:
        in_spec = pl.BlockSpec((NC, tile_v), in_map)

    kernel = _make_sdice_kernel(HW, tile_v, tiles_per_slice, mask_from, mask_any)

    elems = NC * HW
    cost = pl.CostEstimate(
        flops=4 * elems,
        transcendentals=0,
        bytes_accessed=elems * (pi + gi) + n_slices * NC * 3 * 4,
    )

    partial = pl.pallas_call(
        kernel,
        out_shape=jax.ShapeDtypeStruct((n_slices, NC, 3), jnp.float32),
        grid_spec=pltpu.PrefetchScalarGridSpec(
            num_scalar_prefetch=0,
            grid=(n_slices, tiles_per_slice),
            in_specs=[in_spec, in_spec],
            out_specs=pl.BlockSpec((1, NC, 3), lambda s, i: (s, 0, 0)),
            scratch_shapes=[pltpu.VMEM((NC, 1), jnp.float32)] * 3,
        ),
        compiler_params=pltpu.CompilerParams(
            dimension_semantics=("parallel", "arbitrary"),
            vmem_limit_bytes=vmem_limit,
        ),
        cost_estimate=cost,
    )(p2, g2)

    # Tiny JAX epilogue: combine per-slice partials, fold N, dice, -log, mean over classes.
    sums = jnp.sum(partial, axis=0).reshape(N, C, 3).sum(axis=0)     # (C, 3)
    intersect, ref_vol, seg_vol = sums[:, 0], sums[:, 1], sums[:, 2]
    dice = (2.0 * intersect + 1e-05) / (ref_vol + seg_vol + 1.0 + 1e-05)
    return jnp.mean(-jnp.log(dice))


def _sdice_loss_ref(preds, targets):
    """Pure-JAX reference matching the PyTorch module (channel-first one-hot inputs)."""
    N, C = preds.shape[0], preds.shape[1]
    p = preds.reshape(N, C, -1).astype(jnp.float32)
    g = targets.reshape(N, C, -1).astype(jnp.float32)
    intersect = jnp.sum(g * p, axis=(0, 2))
    ref_vol = jnp.sum(g, axis=(0, 2))
    seg_vol = jnp.sum(p, axis=(0, 2))
    dice = (2.0 * intersect + 1e-05) / (ref_vol + seg_vol + 1.0 + 1e-05)
    return jnp.mean(-jnp.log(dice))


if __name__ == "__main__":
    key = jax.random.PRNGKey(0)
    k1, k2, k3, k4 = jax.random.split(key, 4)

    # Case 1: small module-consistent shapes (single-tile path, auto geometry).
    N, C, H, W = 2, 4, 16, 16
    logits = jax.random.normal(k1, (N, C, H, W), dtype=jnp.float32)
    preds = jax.nn.softmax(logits, axis=1)
    labels = jax.random.randint(k2, (N, H, W), 0, C)
    targets = jax.nn.one_hot(labels, C, axis=1, dtype=jnp.float32)     # (N, C, H, W)

    loss = jax.block_until_ready(sdice_loss(preds, targets))
    loss_ref = jax.block_until_ready(_sdice_loss_ref(preds, targets))
    assert jnp.allclose(loss, loss_ref, rtol=1e-5, atol=1e-6), (loss, loss_ref)

    # Case 2: multi-tile streaming, ragged-tail masking, phantom tile, 2-way parallel split.
    N2, C2, H2, W2 = 2, 4, 48, 48            # HW = 2304; tile_v=512 -> 5 tiles (last ragged)
    logits2 = jax.random.normal(k3, (N2, C2, H2, W2), dtype=jnp.float32)
    preds2 = jax.nn.softmax(logits2, axis=1)
    labels2 = jax.random.randint(k4, (N2, H2, W2), 0, C2)
    targets2 = jax.nn.one_hot(labels2, C2, axis=1, dtype=jnp.float32)

    loss2 = jax.block_until_ready(sdice_loss(preds2, targets2, tile_v=512, num_slices=2))
    loss2_ref = jax.block_until_ready(_sdice_loss_ref(preds2, targets2))
    assert jnp.allclose(loss2, loss2_ref, rtol=1e-5, atol=1e-6), (loss2, loss2_ref)

    print("KERNEL_OK")
</pallas_src>

<mosaic_0001>
module attributes {stable_mosaic.version = 11 : i64} {
  func.func @kernel(%arg0: i32, %arg1: i32, %arg2: memref<8x256xf32, #tpu.memory_space<vmem>>, %arg3: memref<8x256xf32, #tpu.memory_space<vmem>>, %arg4: memref<1x8x3xf32, #tpu.memory_space<vmem>>, %arg5: memref<8x1xf32, #tpu.memory_space<vmem>>, %arg6: memref<8x1xf32, #tpu.memory_space<vmem>>, %arg7: memref<8x1xf32, #tpu.memory_space<vmem>>) attributes {dimension_semantics = [#tpu.dimension_semantics<parallel>, #tpu.dimension_semantics<arbitrary>], iteration_bounds = array<i64: 1, 1>, scalar_prefetch = 0 : i64, scratch_operands = 3 : i64, tpu.core_type = #tpu.core_type<tc>, window_params = [{transform_indices = @transform_0, window_bounds = array<i64: 8, 256>}, {transform_indices = @transform_1, window_bounds = array<i64: 8, 256>}, {transform_indices = @transform_2, window_bounds = array<i64: 1, 8, 3>}]} {
    %c0_i32 = arith.constant 0 : i32
    %0 = arith.cmpi eq, %arg1, %c0_i32 : i32
    %1 = arith.extui %0 : i1 to i32
    %c0_i32_0 = arith.constant 0 : i32
    %2 = arith.cmpi ne, %1, %c0_i32_0 : i32
    scf.if %2 {
      %cst_20 = arith.constant 0.000000e+00 : f32
      %24 = vector.broadcast %cst_20 : f32 to vector<8x1xf32>
      %c0_21 = arith.constant 0 : index
      %c0_22 = arith.constant 0 : index
      %25 = vector.load %arg5[%c0_21, %c0_22] : memref<8x1xf32, #tpu.memory_space<vmem>>, vector<8x1xf32>
      tpu.vector_store %arg5[%c0_21, %c0_22], %24 {strides = array<i32>} : memref<8x1xf32, #tpu.memory_space<vmem>>, vector<8x1xf32>,
      %cst_23 = arith.constant 0.000000e+00 : f32
      %26 = vector.broadcast %cst_23 : f32 to vector<8x1xf32>
      %c0_24 = arith.constant 0 : index
      %c0_25 = arith.constant 0 : index
      %27 = vector.load %arg6[%c0_24, %c0_25] : memref<8x1xf32, #tpu.memory_space<vmem>>, vector<8x1xf32>
      tpu.vector_store %arg6[%c0_24, %c0_25], %26 {strides = array<i32>} : memref<8x1xf32, #tpu.memory_space<vmem>>, vector<8x1xf32>,
      %cst_26 = arith.constant 0.000000e+00 : f32
      %28 = vector.broadcast %cst_26 : f32 to vector<8x1xf32>
      %c0_27 = arith.constant 0 : index
      %c0_28 = arith.constant 0 : index
      %29 = vector.load %arg7[%c0_27, %c0_28] : memref<8x1xf32, #tpu.memory_space<vmem>>, vector<8x1xf32>
      tpu.vector_store %arg7[%c0_27, %c0_28], %28 {strides = array<i32>} : memref<8x1xf32, #tpu.memory_space<vmem>>, vector<8x1xf32>,
    } else {
    }
    %c0 = arith.constant 0 : index
    %c0_1 = arith.constant 0 : index
    %3 = vector.load %arg2[%c0, %c0_1] : memref<8x256xf32, #tpu.memory_space<vmem>>, vector<8x256xf32>
    %c0_2 = arith.constant 0 : index
    %c0_3 = arith.constant 0 : index
    %4 = vector.load %arg3[%c0_2, %c0_3] : memref<8x256xf32, #tpu.memory_space<vmem>>, vector<8x256xf32>
    %c0_4 = arith.constant 0 : index
    %c0_5 = arith.constant 0 : index
    %5 = vector.load %arg5[%c0_4, %c0_5] : memref<8x1xf32, #tpu.memory_space<vmem>>, vector<8x1xf32>
    %6 = arith.mulf %3, %4 : vector<8x256xf32>
    %cst = arith.constant dense<0.000000e+00> : vector<8xf32>
    %7 = vector.multi_reduction <add>, %6, %cst [1] : vector<8x256xf32> to vector<8xf32>
    %8 = vector.shape_cast %7 : vector<8xf32> to vector<8x1xf32>
    %9 = arith.addf %5, %8 : vector<8x1xf32>
    %c0_6 = arith.constant 0 : index
    %c0_7 = arith.constant 0 : index
    %10 = vector.load %arg5[%c0_6, %c0_7] : memref<8x1xf32, #tpu.memory_space<vmem>>, vector<8x1xf32>
    tpu.vector_store %arg5[%c0_6, %c0_7], %9 {strides = array<i32>} : memref<8x1xf32, #tpu.memory_space<vmem>>, vector<8x1xf32>,
    %c0_8 = arith.constant 0 : index
    %c0_9 = arith.constant 0 : index
    %11 = vector.load %arg6[%c0_8, %c0_9] : memref<8x1xf32, #tpu.memory_space<vmem>>, vector<8x1xf32>
    %cst_10 = arith.constant dense<0.000000e+00> : vector<8xf32>
    %12 = vector.multi_reduction <add>, %4, %cst_10 [1] : vector<8x256xf32> to vector<8xf32>
    %13 = vector.shape_cast %12 : vector<8xf32> to vector<8x1xf32>
    %14 = arith.addf %11, %13 : vector<8x1xf32>
    %c0_11 = arith.constant 0 : index
    %c0_12 = arith.constant 0 : index
    %15 = vector.load %arg6[%c0_11, %c0_12] : memref<8x1xf32, #tpu.memory_space<vmem>>, vector<8x1xf32>
    tpu.vector_store %arg6[%c0_11, %c0_12], %14 {strides = array<i32>} : memref<8x1xf32, #tpu.memory_space<vmem>>, vector<8x1xf32>,
    %c0_13 = arith.constant 0 : index
    %c0_14 = arith.constant 0 : index
    %16 = vector.load %arg7[%c0_13, %c0_14] : memref<8x1xf32, #tpu.memory_space<vmem>>, vector<8x1xf32>
    %cst_15 = arith.constant dense<0.000000e+00> : vector<8xf32>
    %17 = vector.multi_reduction <add>, %3, %cst_15 [1] : vector<8x256xf32> to vector<8xf32>
    %18 = vector.shape_cast %17 : vector<8xf32> to vector<8x1xf32>
    %19 = arith.addf %16, %18 : vector<8x1xf32>
    %c0_16 = arith.constant 0 : index
    %c0_17 = arith.constant 0 : index
    %20 = vector.load %arg7[%c0_16, %c0_17] : memref<8x1xf32, #tpu.memory_space<vmem>>, vector<8x1xf32>
    tpu.vector_store %arg7[%c0_16, %c0_17], %19 {strides = array<i32>} : memref<8x1xf32, #tpu.memory_space<vmem>>, vector<8x1xf32>,
    %c0_i32_18 = arith.constant 0 : i32
    %21 = arith.cmpi eq, %arg1, %c0_i32_18 : i32
    %22 = arith.extui %21 : i1 to i32
    %c0_i32_19 = arith.constant 0 : i32
    %23 = arith.cmpi ne, %22, %c0_i32_19 : i32
    scf.if %23 {
      %c0_20 = arith.constant 0 : index
      %c0_21 = arith.constant 0 : index
      %24 = vector.load %arg5[%c0_20, %c0_21] : memref<8x1xf32, #tpu.memory_space<vmem>>, vector<8x1xf32>
      %c0_22 = arith.constant 0 : index
      %c0_23 = arith.constant 0 : index
      %c0_24 = arith.constant 0 : index
      %25 = vector.load %arg4[%c0_22, %c0_23, %c0_24] : memref<1x8x3xf32, #tpu.memory_space<vmem>>, vector<1x8x1xf32>
      %26 = vector.shape_cast %25 : vector<1x8x1xf32> to vector<8x1xf32>
      %27 = vector.shape_cast %24 : vector<8x1xf32> to vector<1x8x1xf32>
      tpu.vector_store %arg4[%c0_22, %c0_23, %c0_24], %27 {strides = array<i32>} : memref<1x8x3xf32, #tpu.memory_space<vmem>>, vector<1x8x1xf32>,
      %c0_25 = arith.constant 0 : index
      %c0_26 = arith.constant 0 : index
      %28 = vector.load %arg6[%c0_25, %c0_26] : memref<8x1xf32, #tpu.memory_space<vmem>>, vector<8x1xf32>
      %c0_27 = arith.constant 0 : index
      %c0_28 = arith.constant 0 : index
      %c1 = arith.constant 1 : index
      %29 = vector.load %arg4[%c0_27, %c0_28, %c1] : memref<1x8x3xf32, #tpu.memory_space<vmem>>, vector<1x8x1xf32>
      %30 = vector.shape_cast %29 : vector<1x8x1xf32> to vector<8x1xf32>
      %31 = vector.shape_cast %28 : vector<8x1xf32> to vector<1x8x1xf32>
      tpu.vector_store %arg4[%c0_27, %c0_28, %c1], %31 {strides = array<i32>} : memref<1x8x3xf32, #tpu.memory_space<vmem>>, vector<1x8x1xf32>,
      %c0_29 = arith.constant 0 : index
      %c0_30 = arith.constant 0 : index
      %32 = vector.load %arg7[%c0_29, %c0_30] : memref<8x1xf32, #tpu.memory_space<vmem>>, vector<8x1xf32>
      %c0_31 = arith.constant 0 : index
      %c0_32 = arith.constant 0 : index
      %c2 = arith.constant 2 : index
      %33 = vector.load %arg4[%c0_31, %c0_32, %c2] : memref<1x8x3xf32, #tpu.memory_space<vmem>>, vector<1x8x1xf32>
      %34 = vector.shape_cast %33 : vector<1x8x1xf32> to vector<8x1xf32>
      %35 = vector.shape_cast %32 : vector<8x1xf32> to vector<1x8x1xf32>
      tpu.vector_store %arg4[%c0_31, %c0_32, %c2], %35 {strides = array<i32>} : memref<1x8x3xf32, #tpu.memory_space<vmem>>, vector<1x8x1xf32>,
    } else {
    }
    return
  }
  func.func @transform_0(%arg0: i32, %arg1: i32) -> (i32, i32) {
    %c1_i32 = arith.constant 1 : i32
    %0 = arith.muli %arg0, %c1_i32 : i32
    %1 = arith.addi %0, %arg1 : i32
    %c0_i32 = arith.constant 0 : i32
    %2 = arith.minsi %1, %c0_i32 : i32
    %c0_i32_0 = arith.constant 0 : i32
    %c0_i32_1 = arith.constant 0 : i32
    return %c0_i32_0, %2 : i32, i32
  }
  func.func @transform_1(%arg0: i32, %arg1: i32) -> (i32, i32) {
    %c1_i32 = arith.constant 1 : i32
    %0 = arith.muli %arg0, %c1_i32 : i32
    %1 = arith.addi %0, %arg1 : i32
    %c0_i32 = arith.constant 0 : i32
    %2 = arith.minsi %1, %c0_i32 : i32
    %c0_i32_0 = arith.constant 0 : i32
    %c0_i32_1 = arith.constant 0 : i32
    return %c0_i32_0, %2 : i32, i32
  }
  func.func @transform_2(%arg0: i32, %arg1: i32) -> (i32, i32, i32) {
    %c0_i32 = arith.constant 0 : i32
    %c0_i32_0 = arith.constant 0 : i32
    %c0_i32_1 = arith.constant 0 : i32
    return %arg0, %c0_i32, %c0_i32_0 : i32, i32, i32
  }
}

</mosaic_0001>

<bundles_post_ra>
// kernel: tpu_custom_call.1
= control target key start
LH: loop header
LB: loop body
LE: loop exit
PB: predicated region body
PF: predicated region fallthrough
CT: control target
= control target key end

     0   :  { %7 = vsyncpa [#allocation6], 0  ;;  %s230_s0 = inlined_call_operand.hbm [shape: f32[8,256], index: 0, kind: input, shape index: {}]   ;;  %s231_s1 = inlined_call_operand.hbm [shape: f32[8,256], index: 1, kind: input, shape index: {}]   ;;  %s232_s2 = inlined_call_operand.vmem [shape: f32[1,8,3], index: 2, kind: output, shape index: {}]  }
   0x1   :  { %8 = vsyncpa [#allocation8], 0  ;;  %s170_s9 = smov [#allocation5]   ;;  %s171_s11 = smov [#allocation7]  }
   0x2   :  { %s21_s10 = sshll.u32 %s170_s9, 4  ;;  %s37_s12 = sshll.u32 %s171_s11, 4  ;;  %s22_s10 = int_to_ptr.vmem [resolvable:$true] %s21_s10  ;;  %s38_s12 = int_to_ptr.vmem [resolvable:$true] %s37_s12 }
   0x3   :  { %s122_s15 = scalar_lea.hbm %s230_s0, 256 }
   0x4   :  { %p123_p0 = scmp.ne.s32.totalorder %s230_s0, %s122_s15  ;;  %p126_p1 = scmp.lt.u32.totalorder %s122_s15, %s230_s0 }
   0x6   :  { %p128_p2 = pnand %p126_p1, %p123_p0 }
   0x8   :  { %131 = shalt.err (!%p128_p2)
}
   0x9   :  { %s132_s20 = scalar_lea.vmem %s22_s10, 256  ;;  %p137_p4 = scmp.lt.s32.totalorder %s22_s10, %s22_s10 }
   0xa   :  { %p133_p3 = scmp.ne.s32.totalorder %s22_s10, %s132_s20  ;;  %p138_p5 = scmp.lt.s32.totalorder %s132_s20, %s132_s20 }
   0xc   :  { %p139_p6 = por %p138_p5, %p137_p4 }
   0xe   :  { %p140_p7 = pnand %p139_p6, %p133_p3 }
  0x10   :  { %143 = shalt.err (!%p140_p7)
}
  0x11   :  { %24 = dma.hbm_to_vmem [thread:$0]  %s230_s0, 256, %s22_s10, [#allocation6]  }
  0x12   :  { %s144_s25 = scalar_lea.hbm %s231_s1, 256 }
  0x13   :  { %p145_p8 = scmp.ne.s32.totalorder %s231_s1, %s144_s25  ;;  %p148_p9 = scmp.lt.u32.totalorder %s144_s25, %s231_s1 }
  0x15   :  { %p150_p10 = pnand %p148_p9, %p145_p8 }
  0x17   :  { %153 = shalt.err (!%p150_p10)
}
  0x18   :  { %s154_s30 = scalar_lea.vmem %s38_s12, 256  ;;  %p159_p12 = scmp.lt.s32.totalorder %s38_s12, %s38_s12 }
  0x19   :  { %p155_p11 = scmp.ne.s32.totalorder %s38_s12, %s154_s30  ;;  %p160_p13 = scmp.lt.s32.totalorder %s154_s30, %s154_s30 }
  0x1b   :  { %p161_p0 = por %p160_p13, %p159_p12 }
  0x1d   :  { %p162_p1 = pnand %p161_p0, %p155_p11 }
  0x1f   :  { %165 = shalt.err (!%p162_p1)
}
  0x20   :  { %40 = dma.hbm_to_vmem [thread:$0]  %s231_s1, 256, %s38_s12, [#allocation8]  }
  0x21   :  { %166 = dma.done.wait [#allocation6], 256  }
  0x22   :  { %167 = vsyncadd [#allocation6], 4294967040 }
  0x23   :  { %168 = dma.done.wait [#allocation8], 256  }
  0x24   :  { %169 = vsyncadd [#allocation8], 4294967040  ;;  %vm59_vm0 = vcmask 7168   ;;  %v172_v0 = vmov 0.0   ;;  %v65_v1 = vld [vmem:[#allocation7] sm:$0xff]  ;;  %v66_v2 = vld [vmem:[#allocation7 + $0x8] sm:$0xff] }
  0x25   :  { %61 = vst.msk [vmem:[#allocation3] sm:$0xff] %vm59_vm0, %v172_v0  ;;  %60 = vst.msk [vmem:[#allocation2] sm:$0xff] %vm59_vm0, %v172_v0  ;;  %v63_v3 = vld [vmem:[#allocation5] sm:$0xff]  ;;  %v77_v4 = vadd.f32 %v66_v2, %v65_v1  ;;  %v64_v5 = vld [vmem:[#allocation5 + $0x8] sm:$0xff]  ;;  %s173_s1 = smov 1   ;;  %s174_s6 = smov 2  }
  0x26   :  { %62 = vst.msk [vmem:[#allocation4] sm:$0xff] %vm59_vm0, %v172_v0  ;;  %v68_v6 = vmul.f32 %v65_v1, %v63_v3  ;;  %v69_v7 = vmul.f32 %v66_v2, %v64_v5  ;;  %v83_v8 = vadd.f32 %v64_v5, %v63_v3  ;;  %vm98_vm1 = vcmask 15368  }
  0x27   :  { %78 = vadd.xlane.f32.xlu0 %v77_v4  ;;  %vm105_vm2 = vcmask 23568  }
  0x28   :  { %v70_v9 = vadd.f32 %v69_v7, %v68_v6 }
  0x2a   :  { %71 = vadd.xlane.f32.xlu1 %v70_v9 }
  0x2b   :  { %84 = vadd.xlane.f32.xlu0 %v83_v8 }
  0x2c   :  { %v76_v10 = vld [vmem:[#allocation3] sm:$0xff]  ;;  %v67_v13 = vld [vmem:[#allocation2] sm:$0xff] }
  0x2d   :  { %v82_v14 = vld [vmem:[#allocation4] sm:$0xff] }
  0xb4   :  { %v79_v11 = vpop.xlane.xlu0 %78 }
  0xb5   :  { %v80_v12 = vadd.f32 %v79_v11, %v76_v10 }
  0xb7   :  { %81 = vst.msk [vmem:[#allocation3] sm:$0xff] %vm59_vm0, %v80_v12  ;;  %v72_v15 = vpop.xlane.xlu1 %71 }
  0xb8   :  { %v85_v16 = vpop.xlane.xlu0 %84  ;;  %v73_v17 = vadd.f32 %v72_v15, %v67_v13 }
  0xb9   :  { %v86_v18 = vadd.f32 %v85_v16, %v82_v14 }
  0xba   :  { %75 = vst.msk [vmem:[#allocation2] sm:$0xff] %vm59_vm0, %v73_v17 }
  0xbb   :  { %87 = vst.msk [vmem:[#allocation4] sm:$0xff] %vm59_vm0, %v86_v18 }
  0xbe   :  { %v93_v19 = vld [vmem:[#allocation3] sm:$0xff] }
  0xbf   :  { %95 = vrot.lane.b32.xlu1 %v93_v19, %s173_s1 }
  0xc1   :  { %v91_v20 = vld [vmem:[#allocation2] sm:$0xff] }
  0xc2   :  { %v100_v21 = vld [vmem:[#allocation4] sm:$0xff]  ;;  %92 = vst.msk [vmem:[%s232_s2] sm:$0xff] %vm59_vm0, %v91_v20 }
  0xc3   :  { %102 = vrot.lane.b32.xlu0 %v100_v21, %s174_s6 }
 0x131   :  { %v96_v22 = vpop.permute.xlu1 %95 }
 0x132   :  { %99 = vst.msk [vmem:[%s232_s2] sm:$0xff] %vm98_vm1, %v96_v22 }
 0x135   :  { %v103_v23 = vpop.permute.xlu0 %102 }
 0x136   :  { %106 = vst.msk [vmem:[%s232_s2] sm:$0xff] %vm105_vm2, %v103_v23 }
 0x137   :  { %111 = vsyncpa [#allocation6], 1 }
 0x138   :  { %112 = vsyncpa [#allocation8], 1 }

</bundles_post_ra>
